<compile_context>
chip_gen: v7x
topology: tpu7x:2x2x1
jax: 0.10.0
libtpu: 0.0.40
codegen_flags: <defaults>
</compile_context>

<pallas_src>
import functools

import jax
import jax.numpy as jnp
from jax.experimental import pallas as pl
from jax.experimental.pallas import tpu as pltpu

EPS = 1e-12  # matches torch.nn.functional.normalize default eps


def _round_up(a, b):
    return ((a + b - 1) // b) * b


# ----------------------------------------------------------------------------
# Kernel 1: process memory bank with the shared MLP and L2-normalize rows.
# ----------------------------------------------------------------------------
def memory_mlp_kernel(mem_ref, w1_ref, b1_ref, w2_ref, b2_ref, out_ref):
    mem = mem_ref[...]                                                 # [K, C]
    h = jnp.dot(mem, w1_ref[...], preferred_element_type=jnp.float32) + b1_ref[...]
    h = jnp.maximum(h, 0.0)                                            # ReLU
    p = jnp.dot(h, w2_ref[...], preferred_element_type=jnp.float32) + b2_ref[...]
    p = jnp.maximum(p, 0.0)                                            # ReLU
    norm = jnp.sqrt(jnp.sum(p * p, axis=1, keepdims=True))
    out_ref[...] = p / jnp.maximum(norm, EPS)                          # F.normalize(dim=1)


# ----------------------------------------------------------------------------
# Kernel 2: pixel-wise memory attention on lane-dense [*, TM] tiles.
# ----------------------------------------------------------------------------
def attention_kernel(x_ref, memn_ref, memnT_ref, out_ref, att_ref, *, shrink_thres):
    x = x_ref[...]            # [C, TM]  (one pixel per lane column)
    mem = memn_ref[...]       # [K, C]
    memT = memnT_ref[...]     # [C, K]   (pre-transposed once, outside the grid)

    # L2 normalize each pixel column (F.normalize(dim=1) in the row-major view)
    ssum = jnp.sum(x * x, axis=0, keepdims=True)                       # [1, TM]
    inv_n = 1.0 / jnp.maximum(jnp.sqrt(ssum), EPS)
    xn = x * inv_n

    # cosine-similarity logits: [K, C] @ [C, TM] -> [K, TM]  (no in-kernel transpose)
    logits = jnp.dot(mem, xn, preferred_element_type=jnp.float32)

    # softmax over memory slots (axis 0), denominator fused into the shrink step
    m = jnp.max(logits, axis=0, keepdims=True)                         # [1, TM]
    e = jnp.exp(logits - m)                                            # [K, TM]
    s = jnp.sum(e, axis=0, keepdims=True)                              # [1, TM]

    if shrink_thres > 0:
        # relu(e/s - t) then L1-normalize  ==  relu(e - t*s) / max(sum(relu(e - t*s)), s*eps)
        r = jnp.maximum(e - shrink_thres * s, 0.0)
        l1 = jnp.sum(r, axis=0, keepdims=True)
        att = r * (1.0 / jnp.maximum(l1, s * EPS))
    else:
        att = e * (1.0 / s)

    att_ref[...] = att                                                 # [K, TM] lane-dense
    out_ref[...] = jnp.dot(memT, att, preferred_element_type=jnp.float32)  # [C, TM]


# ----------------------------------------------------------------------------
# Python wrapper reproducing TemporalMemoryModule.forward
# ----------------------------------------------------------------------------
def temporal_memory_forward(x, memory, w1, b1, w2, b2,
                            shrink_thres=0.0025, tile_m=8192):
    N, C, H, W = x.shape
    K = memory.shape[0]
    M = N * H * W

    x = x.astype(jnp.float32)

    # --- memory MLP + L2 normalize (single-shot kernel) ---
    memory_norm = pl.pallas_call(
        memory_mlp_kernel,
        out_shape=jax.ShapeDtypeStruct((K, C), jnp.float32),
    )(memory.astype(jnp.float32),
      w1.astype(jnp.float32), b1.reshape(1, -1).astype(jnp.float32),
      w2.astype(jnp.float32), b2.reshape(1, -1).astype(jnp.float32))
    memory_norm_t = memory_norm.T        # [C, K]: tiny one-time glue transpose

    # --- channel-first flat view for the kernel: [C, M] (cheap leading-axis transpose)
    x_cm = jnp.transpose(x, (1, 0, 2, 3)).reshape(C, M)

    # --- tile selection: large lane-dense tiles; keep >= 2 grid steps for megacore ---
    tile = _round_up(min(max(tile_m, 128), _round_up(M, 128)), 128)
    grid = pl.cdiv(M, tile)
    if grid == 1 and tile >= 256:
        tile = _round_up((tile + 1) // 2, 128)
        grid = pl.cdiv(M, tile)
    M_pad = grid * tile
    if M_pad != M:
        x_cm = jnp.pad(x_cm, ((0, 0), (0, M_pad - M)))   # padded pixels sliced off below

    # VMEM per step (double-buffered): ~2 * tile * (C + C + K) * 4B  (~8.4 MB at tile=8192)
    out_cm, att_km = pl.pallas_call(
        functools.partial(attention_kernel, shrink_thres=shrink_thres),
        out_shape=(jax.ShapeDtypeStruct((C, M_pad), jnp.float32),
                   jax.ShapeDtypeStruct((K, M_pad), jnp.float32)),
        grid_spec=pltpu.PrefetchScalarGridSpec(
            num_scalar_prefetch=0,
            grid=(grid,),
            in_specs=[pl.BlockSpec((C, tile), lambda i: (0, i)),
                      pl.BlockSpec((K, C), lambda i: (0, 0)),
                      pl.BlockSpec((C, K), lambda i: (0, 0))],
            out_specs=[pl.BlockSpec((C, tile), lambda i: (0, i)),
                       pl.BlockSpec((K, tile), lambda i: (0, i))],
        ),
        compiler_params=pltpu.CompilerParams(
            dimension_semantics=("parallel",)),
    )(x_cm, memory_norm, memory_norm_t)

    out_cm = out_cm[:, :M]               # [C, M]
    att_km = att_km[:, :M]               # [K, M]

    # --- glue reshapes back to the torch return layout (leading-axis transposes) ---
    output = jnp.transpose(out_cm.reshape(C, N, H, W), (1, 0, 2, 3))   # [N, C, H, W]
    att = jnp.transpose(att_km.reshape(K, N, H, W), (1, 0, 2, 3))      # [N, K, H, W]
    raw_attention = att_km.T                                           # [M, K]
    input_flat = jnp.transpose(x, (0, 2, 3, 1)).reshape(-1, C)         # [M, C] (dict only)

    return {
        'output': output,               # [N, C, H, W]
        'att': att,                     # [N, mem_dim, H, W]
        'input_flat': input_flat,       # [N*H*W, C]
        'memory': memory_norm,          # [mem_dim, C]
        'raw_attention': raw_attention,  # [N*H*W, mem_dim]
    }


# ----------------------------------------------------------------------------
# Pure-JAX reference (for correctness check only)
# ----------------------------------------------------------------------------
def reference_forward(x, memory, w1, b1, w2, b2, shrink_thres=0.0025):
    N, C, H, W = x.shape
    K = memory.shape[0]
    inp = jnp.transpose(x, (0, 2, 3, 1)).reshape(-1, C)
    inp_n = inp / jnp.maximum(jnp.linalg.norm(inp, axis=1, keepdims=True), EPS)
    h = jnp.maximum(memory @ w1 + b1, 0.0)
    p = jnp.maximum(h @ w2 + b2, 0.0)
    mem_n = p / jnp.maximum(jnp.linalg.norm(p, axis=1, keepdims=True), EPS)
    att = jax.nn.softmax(inp_n @ mem_n.T, axis=1)
    if shrink_thres > 0:
        att = jnp.maximum(att - shrink_thres, 0.0)
        att = att / jnp.maximum(jnp.sum(jnp.abs(att), axis=1, keepdims=True), EPS)
    out = att @ mem_n
    return (jnp.transpose(out.reshape(N, H, W, C), (0, 3, 1, 2)),
            jnp.transpose(att.reshape(N, H, W, K), (0, 3, 1, 2)),
            att)


if __name__ == "__main__":
    # Small shapes consistent with the module
    N, C, H, W = 2, 32, 16, 16        # fea_dim = C = 32
    mem_dim = 64
    hid = C // 2
    shrink_thres = 0.0025

    key = jax.random.PRNGKey(0)
    k_x, k_mem, k_w1, k_b1, k_w2, k_b2 = jax.random.split(key, 6)

    x = jax.random.normal(k_x, (N, C, H, W), dtype=jnp.float32)

    # memory buffer: randn then L2-normalize rows (as in __init__)
    memory = jax.random.normal(k_mem, (mem_dim, C), dtype=jnp.float32)
    memory = memory / jnp.maximum(jnp.linalg.norm(memory, axis=1, keepdims=True), EPS)

    # nn.Linear-style init: U(-1/sqrt(fan_in), 1/sqrt(fan_in)), stored as [in, out]
    b1_bound = 1.0 / (C ** 0.5)
    b2_bound = 1.0 / (hid ** 0.5)
    w1 = jax.random.uniform(k_w1, (C, hid), minval=-b1_bound, maxval=b1_bound, dtype=jnp.float32)
    b1 = jax.random.uniform(k_b1, (hid,), minval=-b1_bound, maxval=b1_bound, dtype=jnp.float32)
    w2 = jax.random.uniform(k_w2, (hid, C), minval=-b2_bound, maxval=b2_bound, dtype=jnp.float32)
    b2 = jax.random.uniform(k_b2, (C,), minval=-b2_bound, maxval=b2_bound, dtype=jnp.float32)

    result = temporal_memory_forward(x, memory, w1, b1, w2, b2,
                                     shrink_thres=shrink_thres, tile_m=8192)
    jax.block_until_ready(result)

    ref_out, ref_att, ref_raw = reference_forward(x, memory, w1, b1, w2, b2, shrink_thres)
    assert jnp.allclose(result['output'], ref_out, atol=1e-5, rtol=1e-4)
    assert jnp.allclose(result['att'], ref_att, atol=1e-5, rtol=1e-4)
    assert jnp.allclose(result['raw_attention'], ref_raw, atol=1e-5, rtol=1e-4)

    print("KERNEL_OK")
</pallas_src>

<mosaic_0001>
module attributes {stable_mosaic.version = 11 : i64} {
  func.func @memory_mlp_kernel(%arg0: memref<64x32xf32, #tpu.memory_space<vmem>>, %arg1: memref<32x16xf32, #tpu.memory_space<vmem>>, %arg2: memref<1x16xf32, #tpu.memory_space<vmem>>, %arg3: memref<16x32xf32, #tpu.memory_space<vmem>>, %arg4: memref<1x32xf32, #tpu.memory_space<vmem>>, %arg5: memref<64x32xf32, #tpu.memory_space<vmem>>) attributes {dimension_semantics = [], scalar_prefetch = 0 : i64, scratch_operands = 0 : i64, tpu.core_type = #tpu.core_type<tc>} {
    %c0 = arith.constant 0 : index
    %c0_0 = arith.constant 0 : index
    %0 = vector.load %arg0[%c0, %c0_0] : memref<64x32xf32, #tpu.memory_space<vmem>>, vector<64x32xf32>
    %c0_1 = arith.constant 0 : index
    %c0_2 = arith.constant 0 : index
    %1 = vector.load %arg1[%c0_1, %c0_2] : memref<32x16xf32, #tpu.memory_space<vmem>>, vector<32x16xf32>
    %cst = arith.constant dense<0.000000e+00> : vector<64x16xf32>
    %2 = tpu.matmul %0, %1, %cst {dimension_numbers = #tpu.dot_dimension_numbers<[1], [0], [0], [1], [0, 0, 1, 1], [], []>} : vector<64x32xf32>, vector<32x16xf32>, vector<64x16xf32> -> vector<64x16xf32>
    %c0_3 = arith.constant 0 : index
    %c0_4 = arith.constant 0 : index
    %3 = vector.load %arg2[%c0_3, %c0_4] : memref<1x16xf32, #tpu.memory_space<vmem>>, vector<1x16xf32>
    %4 = vector.broadcast %3 : vector<1x16xf32> to vector<64x16xf32>
    %5 = arith.addf %2, %4 : vector<64x16xf32>
    %cst_5 = arith.constant 0.000000e+00 : f32
    %6 = vector.broadcast %cst_5 : f32 to vector<64x16xf32>
    %7 = arith.maximumf %5, %6 : vector<64x16xf32>
    %c0_6 = arith.constant 0 : index
    %c0_7 = arith.constant 0 : index
    %8 = vector.load %arg3[%c0_6, %c0_7] : memref<16x32xf32, #tpu.memory_space<vmem>>, vector<16x32xf32>
    %cst_8 = arith.constant dense<0.000000e+00> : vector<64x32xf32>
    %9 = tpu.matmul %7, %8, %cst_8 {dimension_numbers = #tpu.dot_dimension_numbers<[1], [0], [0], [1], [0, 0, 1, 1], [], []>} : vector<64x16xf32>, vector<16x32xf32>, vector<64x32xf32> -> vector<64x32xf32>
    %c0_9 = arith.constant 0 : index
    %c0_10 = arith.constant 0 : index
    %10 = vector.load %arg4[%c0_9, %c0_10] : memref<1x32xf32, #tpu.memory_space<vmem>>, vector<1x32xf32>
    %11 = vector.broadcast %10 : vector<1x32xf32> to vector<64x32xf32>
    %12 = arith.addf %9, %11 : vector<64x32xf32>
    %cst_11 = arith.constant 0.000000e+00 : f32
    %13 = vector.broadcast %cst_11 : f32 to vector<64x32xf32>
    %14 = arith.maximumf %12, %13 : vector<64x32xf32>
    %15 = arith.mulf %14, %14 : vector<64x32xf32>
    %cst_12 = arith.constant dense<0.000000e+00> : vector<64xf32>
    %16 = vector.multi_reduction <add>, %15, %cst_12 [1] : vector<64x32xf32> to vector<64xf32>
    %17 = vector.shape_cast %16 : vector<64xf32> to vector<64x1xf32>
    %18 = math.sqrt %17 : vector<64x1xf32>
    %cst_13 = arith.constant 9.99999996E-13 : f32
    %19 = vector.broadcast %cst_13 : f32 to vector<64x1xf32>
    %20 = arith.maximumf %18, %19 : vector<64x1xf32>
    %21 = vector.broadcast %20 : vector<64x1xf32> to vector<64x32xf32>
    %22 = arith.divf %14, %21 : vector<64x32xf32>
    %c0_14 = arith.constant 0 : index
    %c0_15 = arith.constant 0 : index
    %23 = vector.load %arg5[%c0_14, %c0_15] : memref<64x32xf32, #tpu.memory_space<vmem>>, vector<64x32xf32>
    tpu.vector_store %arg5[%c0_14, %c0_15], %22 {strides = array<i32>} : memref<64x32xf32, #tpu.memory_space<vmem>>, vector<64x32xf32>,
    return
  }
}

</mosaic_0001>

<bundles_post_ra>
// kernel: tpu_custom_call.1
= control target key start
LH: loop header
LB: loop body
LE: loop exit
PB: predicated region body
PF: predicated region fallthrough
CT: control target
= control target key end

     0   :  { %vm39_vm0 = vcmask 261120   ;;  %vm186_vm1 = vcmask 130048   ;;  %s758_s1 = inlined_call_operand.vmem [shape: f32[32,16], index: 1, kind: input, shape index: {}]   ;;  %s759_s0 = inlined_call_operand.vmem [shape: f32[64,32], index: 0, kind: input, shape index: {}]   ;;  %s760_s3 = inlined_call_operand.vmem [shape: f32[16,32], index: 3, kind: input, shape index: {}]   ;;  %s761_s2 = inlined_call_operand.vmem [shape: f32[1,16], index: 2, kind: input, shape index: {}]   ;;  %s762_s4 = inlined_call_operand.vmem [shape: f32[1,32], index: 4, kind: input, shape index: {}]   ;;  %s763_s5 = inlined_call_operand.vmem [shape: f32[64,32], index: 5, kind: output, shape index: {}]  }
   0x1   :  { %v28_v0 = vld [vmem:[%s758_s1] sm:$0xff]  ;;  %v29_v1 = vld [vmem:[%s758_s1 + $0x8] sm:$0xff]  ;;  %v30_v2 = vld [vmem:[%s758_s1 + $0x10] sm:$0xff] }
   0x2   :  { %v524_v3 = vpack.c.bf16 %v29_v1, %v28_v0  ;;  %v31_v4 = vld [vmem:[%s758_s1 + $0x18] sm:$0xff]  ;;  %v20_v5 = vld [vmem:[%s759_s0] sm:$0xff]  ;;  %v21_v7 = vld [vmem:[%s759_s0 + $0x8] sm:$0xff] }
   0x3   :  { %v528_v6 = vpack.c.bf16 %v31_v4, %v30_v2  ;;  %496 = vmatprep.mubr.msk.f32.mxu0 %vm39_vm0, %v20_v5  ;;  %v22_v8 = vld [vmem:[%s759_s0 + $0x10] sm:$0xff]  ;;  %v23_v9 = vld [vmem:[%s759_s0 + $0x18] sm:$0xff]  ;;  %v24_v10 = vld [vmem:[%s759_s0 + $0x20] sm:$0xff] }
   0x4   :  { %525 = vmatprep.subr.bf16.mxu0 %v524_v3  ;;  %v25_v11 = vld [vmem:[%s759_s0 + $0x28] sm:$0xff]  ;;  %v26_v12 = vld [vmem:[%s759_s0 + $0x30] sm:$0xff]  ;;  %v27_v13 = vld [vmem:[%s759_s0 + $0x38] sm:$0xff] }
   0x5   :  { %527 = vmatpush3.bf16.msra.mxu0 %v524_v3  ;;  %v177_v14 = vld [vmem:[%s760_s3] sm:$0xff]  ;;  %v178_v15 = vld [vmem:[%s760_s3 + $0x8] sm:$0xff] }
   0x6   :  { %529 = vmatprep.subr.bf16.mxu0 %v528_v6  ;;  %v532_v16 = vpack.c.bf16 %v178_v15, %v177_v14  ;;  %v448_v17 = vld [vmem:[%s761_s2] ss:$0 sm:$0xff] }
   0x7   :  { %v457_v42 = vld [vmem:[%s762_s4] ss:$0 sm:$0xff] }
   0x8   :  { %533 = vmatprep.subr.bf16.mxu1 %v532_v16 }
   0x9   :  { %531 = vmatpush3.bf16.msra.mxu0 %v528_v6  ;;  %535 = vmatpush3.bf16.msra.mxu1 %v532_v16 }
   0xc   :  { %497 = vmatmul.mubr.msk.f32.vlgmr.msra.gmra.mrb[0].mxu0 %vm39_vm0, %v21_v7 }
   0xd   :  { %499 = vmatprep.mubr.msk.f32.mxu0 %vm39_vm0, %v22_v8 }
  0x10   :  { %500 = vmatmul.mubr.msk.f32.gmra.mrb[2].mxu0 %vm39_vm0, %v23_v9 }
  0x11   :  { %502 = vmatprep.mubr.msk.f32.mxu0 %vm39_vm0, %v24_v10 }
  0x14   :  { %503 = vmatmul.mubr.msk.f32.gmra.mrb[4].mxu0 %vm39_vm0, %v25_v11 }
  0x15   :  { %505 = vmatprep.mubr.msk.f32.mxu0 %vm39_vm0, %v26_v12 }
  0x18   :  { %506 = vmatmul.mubr.msk.f32.gmra.mrb[6].mxu0 %vm39_vm0, %v27_v13 }
  0xdf   :  { %v498_v18 = vpop.f32.mrb[0].mxu0 }
  0xe0   :  { %v136_v19 = vadd.f32 %v498_v18, %v448_v17  ;;  %v130_v20 = vpop.f32.mrb[1].mxu0 }
  0xe1   :  { %v131_v21 = vadd.f32 %v448_v17, %v130_v20 }
  0xe2   :  { %v170_v24 = vmax.f32 %v136_v19, 0.0 }
  0xe3   :  { %v169_v22 = vmax.f32 %v131_v21, 0.0  ;;  %v501_v23 = vpop.f32.mrb[2].mxu0 }
  0xe4   :  { %v146_v25 = vadd.f32 %v501_v23, %v448_v17  ;;  %v140_v26 = vpop.f32.mrb[3].mxu0 }
  0xe5   :  { %v141_v27 = vadd.f32 %v448_v17, %v140_v26  ;;  %512 = vmatprep.mubr.msk.f32.mxu1 %vm186_vm1, %v169_v22 }
  0xe6   :  { %513 = vmatmul.mubr.msk.f32.vlgmr.msra.gmra.mrb[0].mxu1 %vm186_vm1, %v170_v24  ;;  %v172_v30 = vmax.f32 %v146_v25, 0.0 }
  0xe7   :  { %v171_v28 = vmax.f32 %v141_v27, 0.0  ;;  %v504_v29 = vpop.f32.mrb[4].mxu0 }
  0xe8   :  { %v156_v31 = vadd.f32 %v504_v29, %v448_v17  ;;  %v150_v32 = vpop.f32.mrb[5].mxu0 }
  0xe9   :  { %v151_v33 = vadd.f32 %v448_v17, %v150_v32  ;;  %515 = vmatprep.mubr.msk.f32.mxu1 %vm186_vm1, %v171_v28 }
  0xea   :  { %v174_v34 = vmax.f32 %v156_v31, 0.0  ;;  %516 = vmatmul.mubr.msk.f32.gmra.mrb[2].mxu1 %vm186_vm1, %v172_v30 }
  0xeb   :  { %v173_v35 = vmax.f32 %v151_v33, 0.0  ;;  %v507_v36 = vpop.f32.mrb[6].mxu0 }
  0xec   :  { %v166_v37 = vadd.f32 %v507_v36, %v448_v17  ;;  %v160_v38 = vpop.f32.mrb[7].mxu0 }
  0xed   :  { %v161_v39 = vadd.f32 %v448_v17, %v160_v38  ;;  %518 = vmatprep.mubr.msk.f32.mxu1 %vm186_vm1, %v173_v35 }
  0xee   :  { %v176_v40 = vmax.f32 %v166_v37, 0.0  ;;  %519 = vmatmul.mubr.msk.f32.gmra.mrb[4].mxu1 %vm186_vm1, %v174_v34 }
  0xef   :  { %v175_v41 = vmax.f32 %v161_v39, 0.0 }
  0xf1   :  { %521 = vmatprep.mubr.msk.f32.mxu1 %vm186_vm1, %v175_v41 }
  0xf2   :  { %522 = vmatmul.mubr.msk.f32.gmra.mrb[6].mxu1 %vm186_vm1, %v176_v40 }
 0x1b9   :  { %v514_v43 = vpop.f32.mrb[0].mxu1 }
 0x1ba   :  { %v283_v44 = vadd.f32 %v514_v43, %v457_v42  ;;  %v277_v45 = vpop.f32.mrb[1].mxu1 }
 0x1bb   :  { %v278_v46 = vadd.f32 %v457_v42, %v277_v45 }
 0x1bc   :  { %v662_v47 = vmax.f32 %v283_v44, 0.0 }
 0x1bd   :  { %v664_v48 = vmax.f32 %v278_v46, 0.0  ;;  %v517_v49 = vpop.f32.mrb[2].mxu1 }
 0x1be   :  { %v293_v50 = vadd.f32 %v517_v49, %v457_v42  ;;  %v287_v51 = vpop.f32.mrb[3].mxu1  ;;  %v325_v52 = vmul.f32 %v662_v47, %v662_v47 }
 0x1bf   :  { %v288_v53 = vadd.f32 %v457_v42, %v287_v51  ;;  %v324_v56 = vmul.f32 %v664_v48, %v664_v48 }
 0x1c0   :  { %v668_v54 = vmax.f32 %v293_v50, 0.0  ;;  %v335_v55 = vsel %vm39_vm0, %v325_v52, 0.0 }
 0x1c1   :  { %v673_v57 = vmax.f32 %v288_v53, 0.0  ;;  %336 = vadd.xlane.f32.xlu0 %v335_v55  ;;  %v520_v58 = vpop.f32.mrb[4].mxu1  ;;  %v332_v1 = vsel %vm39_vm0, %v324_v56, 0.0 }
 0x1c2   :  { %v303_v59 = vadd.f32 %v520_v58, %v457_v42  ;;  %v297_v60 = vpop.f32.mrb[5].mxu1  ;;  %v327_v61 = vmul.f32 %v668_v54, %v668_v54 }
 0x1c3   :  { %v298_v62 = vadd.f32 %v457_v42, %v297_v60  ;;  %v326_v2 = vmul.f32 %v673_v57, %v673_v57 }
 0x1c4   :  { %v677_v63 = vmax.f32 %v303_v59, 0.0  ;;  %v341_v0 = vsel %vm39_vm0, %v327_v61, 0.0 }
 0x1c5   :  { %v683_v3 = vmax.f32 %v298_v62, 0.0  ;;  %342 = vadd.xlane.f32.xlu1 %v341_v0  ;;  %v523_v4 = vpop.f32.mrb[6].mxu1  ;;  %333 = vadd.xlane.f32.xlu0 %v332_v1  ;;  %v338_v10 = vsel %vm39_vm0, %v326_v2, 0.0 }
 0x1c6   :  { %v313_v5 = vadd.f32 %v523_v4, %v457_v42  ;;  %v307_v6 = vpop.f32.mrb[7].mxu1  ;;  %v329_v11 = vmul.f32 %v677_v63, %v677_v63 }
 0x1c7   :  { %v308_v7 = vadd.f32 %v457_v42, %v307_v6  ;;  %v328_v8 = vmul.f32 %v683_v3, %v683_v3 }
 0x1c8   :  { %v687_v9 = vmax.f32 %v313_v5, 0.0  ;;  %v347_v15 = vsel %vm39_vm0, %v329_v11, 0.0 }
 0x1c9   :  { %v692_v12 = vmax.f32 %v308_v7, 0.0  ;;  %339 = vadd.xlane.f32.xlu1 %v338_v10  ;;  %v344_v13 = vsel %vm39_vm0, %v328_v8, 0.0 }
 0x1ca   :  { %345 = vadd.xlane.f32.xlu0 %v344_v13  ;;  %v331_v16 = vmul.f32 %v687_v9, %v687_v9 }
 0x1cb   :  { %v330_v14 = vmul.f32 %v692_v12, %v692_v12 }
 0x1cc   :  { %v353_v18 = vsel %vm39_vm0, %v331_v16, 0.0 }
 0x1cd   :  { %348 = vadd.xlane.f32.xlu1 %v347_v15  ;;  %v350_v17 = vsel %vm39_vm0, %v330_v14, 0.0 }
 0x1ce   :  { %351 = vadd.xlane.f32.xlu0 %v350_v17 }
 0x1d1   :  { %354 = vadd.xlane.f32.xlu1 %v353_v18 }
 0x24e   :  { %v337_v19 = vpop.xlane.xlu0 %336 }
 0x24f   :  { %536 = vrsqrt.f32 %v337_v19  ;;  %vm365_vm2 = vcmp.eq.f32.partialorder %v337_v19, inf  ;;  %v368_v27 = vand.u32 2147483648, %v337_v19  ;;  %vm367_vm3 = vcmp.eq.f32.partialorder %v337_v19, 0.0 }
 0x252   :  { %v343_v20 = vpop.xlane.xlu1 %342  ;;  %v334_v21 = vpop.xlane.xlu0 %333 }
 0x253   :  { %538 = vrsqrt.f32 %v343_v20  ;;  %vm379_vm4 = vcmp.eq.f32.partialorder %v343_v20, inf  ;;  %vm381_vm5 = vcmp.eq.f32.partialorder %v343_v20, 0.0  ;;  %v382_v36 = vand.u32 2147483648, %v343_v20 }
 0x254   :  { %540 = vrsqrt.f32 %v334_v21  ;;  %vm358_vm6 = vcmp.eq.f32.partialorder %v334_v21, inf  ;;  %v361_v39 = vand.u32 2147483648, %v334_v21  ;;  %vm360_vm7 = vcmp.eq.f32.partialorder %v334_v21, 0.0 }
 0x256   :  { %v340_v22 = vpop.xlane.xlu1 %339 }
 0x257   :  { %542 = vrsqrt.f32 %v340_v22  ;;  %v346_v23 = vpop.xlane.xlu0 %345  ;;  %vm372_vm8 = vcmp.eq.f32.partialorder %v340_v22, inf  ;;  %vm374_vm9 = vcmp.eq.f32.partialorder %v340_v22, 0.0  ;;  %v375_v50 = vand.u32 2147483648, %v340_v22 }
 0x258   :  { %544 = vrsqrt.f32 %v346_v23  ;;  %vm386_vm10 = vcmp.eq.f32.partialorder %v346_v23, inf  ;;  %v389_v53 = vand.u32 2147483648, %v346_v23  ;;  %vm388_vm11 = vcmp.eq.f32.partialorder %v346_v23, 0.0 }
 0x259   :  { %v537_v24 = vpop.eup %536 }
 0x25a   :  { %v364_v25 = vmul.f32 %v537_v24, %v337_v19  ;;  %v349_v26 = vpop.xlane.xlu1 %348 }
 0x25b   :  { %546 = vrsqrt.f32 %v349_v26  ;;  %v702_v28 = vpop.xlane.xlu0 %351  ;;  %vm393_vm12 = vcmp.eq.f32.partialorder %v349_v26, inf  ;;  %vm395_vm13 = vcmp.eq.f32.partialorder %v349_v26, 0.0  ;;  %v396_v1 = vand.u32 2147483648, %v349_v26 }
 0x25c   :  { %v366_v29 = vsel %vm365_vm2, %v337_v19, %v364_v25  ;;  %548 = vrsqrt.f32 %v702_v28  ;;  %vm400_vm14 = vcmp.eq.f32.partialorder %v702_v28, inf  ;;  %v403_v5 = vand.u32 2147483648, %v702_v28 }
 0x25d   :  { %v539_v30 = vpop.eup %538  ;;  %v369_v31 = vsel %vm367_vm3, %v368_v27, %v366_v29  ;;  %vm402_vm15 = vcmp.eq.f32.partialorder %v702_v28, 0.0 }
 0x25e   :  { %v541_v32 = vpop.eup %540  ;;  %v413_v33 = vmax.f32 %v369_v31, 1e-12  ;;  %v378_v34 = vmul.f32 %v539_v30, %v343_v20  ;;  %v705_v35 = vpop.xlane.xlu1 %354 }
 0x25f   :  { %v357_v37 = vmul.f32 %v541_v32, %v334_v21  ;;  %550 = vrsqrt.f32 %v705_v35  ;;  %vm407_vm1 = vcmp.eq.f32.partialorder %v705_v35, inf  ;;  %v410_v17 = vand.u32 2147483648, %v705_v35 }
 0x260   :  { %552 = vrcp.f32 %v413_v33  ;;  %v380_v38 = vsel %vm379_vm4, %v343_v20, %v378_v34  ;;  %vm409_vm2 = vcmp.eq.f32.partialorder %v705_v35, 0.0 }
 0x261   :  { %v543_v40 = vpop.eup %542  ;;  %v383_v41 = vsel %vm381_vm5, %v382_v36, %v380_v38  ;;  %v359_v42 = vsel %vm358_vm6, %v334_v21, %v357_v37 }
 0x262   :  { %v545_v43 = vpop.eup %544  ;;  %v415_v44 = vmax.f32 %v383_v41, 1e-12  ;;  %v362_v45 = vsel %vm360_vm7, %v361_v39, %v359_v42  ;;  %v371_v46 = vmul.f32 %v543_v40, %v340_v22 }
 0x263   :  { %v412_v49 = vmax.f32 %v362_v45, 1e-12  ;;  %v385_v51 = vmul.f32 %v545_v43, %v346_v23 }
 0x264   :  { %554 = vrcp.f32 %v415_v44  ;;  %v373_v52 = vsel %vm372_vm8, %v340_v22, %v371_v46 }
 0x265   :  { %v547_v55 = vpop.eup %546  ;;  %556 = vrcp.f32 %v412_v49  ;;  %v376_v56 = vsel %vm374_vm9, %v375_v50, %v373_v52  ;;  %v387_v58 = vsel %vm386_vm10, %v346_v23, %v385_v51 }
 0x266   :  { %v549_v59 = vpop.eup %548  ;;  %v414_v60 = vmax.f32 %v376_v56, 1e-12  ;;  %v390_v61 = vsel %vm388_vm11, %v389_v53, %v387_v58  ;;  %v392_v62 = vmul.f32 %v547_v55, %v349_v26 }
 0x267   :  { %v416_v0 = vmax.f32 %v390_v61, 1e-12  ;;  %v399_v2 = vmul.f32 %v549_v59, %v702_v28 }
 0x268   :  { %558 = vrcp.f32 %v414_v60  ;;  %v394_v4 = vsel %vm393_vm12, %v349_v26, %v392_v62 }
 0x269   :  { %v551_v6 = vpop.eup %550  ;;  %560 = vrcp.f32 %v416_v0  ;;  %v397_v7 = vsel %vm395_vm13, %v396_v1, %v394_v4  ;;  %v401_v8 = vsel %vm400_vm14, %v702_v28, %v399_v2 }
 0x26a   :  { %v553_v10 = vpop.eup %552  ;;  %v417_v11 = vmax.f32 %v397_v7, 1e-12  ;;  %v404_v13 = vsel %vm402_vm15, %v403_v5, %v401_v8  ;;  %v406_v14 = vmul.f32 %v551_v6, %v705_v35 }
 0x26b   :  { %v423_v15 = vmul.f32 %v553_v10, %v662_v47  ;;  %v418_v16 = vmax.f32 %v404_v13, 1e-12 }
 0x26c   :  { %562 = vrcp.f32 %v417_v11  ;;  %v408_v18 = vsel %vm407_vm1, %v705_v35, %v406_v14 }
 0x26d   :  { %437 = vst.msk [vmem:[%s763_s5 + $0x8] sm:$0xff] %vm39_vm0, %v423_v15  ;;  %564 = vrcp.f32 %v418_v16  ;;  %v411_v19 = vsel %vm409_vm2, %v410_v17, %v408_v18 }
 0x26e   :  { %v555_v20 = vpop.eup %554  ;;  %v419_v21 = vmax.f32 %v411_v19, 1e-12 }
 0x26f   :  { %v557_v47 = vpop.eup %556  ;;  %v427_v22 = vmul.f32 %v555_v20, %v668_v54 }
 0x270   :  { %v421_v23 = vmul.f32 %v557_v47, %v664_v48  ;;  %566 = vrcp.f32 %v419_v21 }
 0x271   :  { %439 = vst.msk [vmem:[%s763_s5 + $0x18] sm:$0xff] %vm39_vm0, %v427_v22 }
 0x272   :  { %v559_v24 = vpop.eup %558  ;;  %436 = vst.msk [vmem:[%s763_s5] sm:$0xff] %vm39_vm0, %v421_v23 }
 0x273   :  { %v561_v25 = vpop.eup %560  ;;  %v425_v26 = vmul.f32 %v559_v24, %v673_v57 }
 0x274   :  { %v429_v27 = vmul.f32 %v561_v25, %v683_v3 }
 0x275   :  { %438 = vst.msk [vmem:[%s763_s5 + $0x10] sm:$0xff] %vm39_vm0, %v425_v26 }
 0x276   :  { %v563_v48 = vpop.eup %562  ;;  %440 = vst.msk [vmem:[%s763_s5 + $0x20] sm:$0xff] %vm39_vm0, %v429_v27 }
 0x277   :  { %v565_v54 = vpop.eup %564  ;;  %v431_v28 = vmul.f32 %v563_v48, %v677_v63 }
 0x278   :  { %v433_v29 = vmul.f32 %v565_v54, %v692_v12 }
 0x279   :  { %441 = vst.msk [vmem:[%s763_s5 + $0x28] sm:$0xff] %vm39_vm0, %v431_v28 }
 0x27a   :  { %v567_v57 = vpop.eup %566  ;;  %442 = vst.msk [vmem:[%s763_s5 + $0x30] sm:$0xff] %vm39_vm0, %v433_v29 }
 0x27b   :  { %v435_v3 = vmul.f32 %v567_v57, %v687_v9 }
 0x27d   :  { %443 = vst.msk [vmem:[%s763_s5 + $0x38] sm:$0xff] %vm39_vm0, %v435_v3 }

</bundles_post_ra>
